<compile_context>
chip_gen: v5e
topology: v5e:2x2
jax: 0.10.0
libtpu: 0.0.40
codegen_flags: <defaults>
</compile_context>

<pallas_src>
import functools

import numpy as np

import jax
import jax.numpy as jnp
from jax.experimental import pallas as pl
from jax.experimental.pallas import tpu as pltpu


# ---------------------------------------------------------------------------
# host-side constant builders (pure layout plumbing)
# ---------------------------------------------------------------------------

def _make_masks(h, w):
    """(9, 1, h*w) f32 validity masks for the 9 taps of a 3x3 'same' conv."""
    hh, ww = np.meshgrid(np.arange(h), np.arange(w), indexing="ij")
    out = []
    for dh in (-1, 0, 1):
        for dw in (-1, 0, 1):
            valid = ((hh + dh >= 0) & (hh + dh < h) &
                     (ww + dw >= 0) & (ww + dw < w))
            out.append(valid.reshape(1, h * w))
    return np.stack(out).astype(np.float32)          # (9, 1, h*w)


def _pick_batch_block(n, hwo, c_in, planes):
    """#batch elements fused onto the lane axis per grid step."""
    per_elem = hwo * (60 * c_in + 72 * planes)        # rough per-element working set, bytes
    cap = max(1, (8 << 20) // max(per_elem, 1))       # keep per-step VMEM modest
    divs = [d for d in range(1, n + 1) if n % d == 0 and d <= cap]
    even = [d for d in divs if (n // d) % 2 == 0]     # v7x: even #steps -> both TCs get work
    return max(even) if even else max(divs)


# ---------------------------------------------------------------------------
# kernel
# ---------------------------------------------------------------------------

def _patches_stride1(x, masks_ref, wo, lanes):
    """im2col of a stride-1 3x3 'same' conv on x:(C, lanes) -> (9*C, lanes) f32.

    lanes = nb*Ho*Wo; per-element border masks (tiled nb times host-side) zero both
    out-of-image taps and any cross-element leakage from the lane rolls.
    """
    taps = []
    for dh in (-1, 0, 1):
        for dw in (-1, 0, 1):
            off = dh * wo + dw
            if off == 0:
                taps.append(x)
            else:
                t = (dh + 1) * 3 + (dw + 1)
                taps.append(pltpu.roll(x, shift=(-off) % lanes, axis=1) * masks_ref[t])
    return jnp.concatenate(taps, axis=0)


def _patches_stride2(x_ph, masks_ref, c_in, wo, lanes):
    """im2col of a stride-2 3x3 'same' conv, directly at output resolution.

    x_ph:(4*c_in, lanes) holds the 4 spatial phases of x (00,01,10,11 stacked on
    channels) at the downsampled (Ho, Wo) grid.  Tap (dh, dw) of the strided conv
    is phase ((dh!=0),(dw!=0)) shifted by (-1 if d==-1 else 0) rows/cols.
    """
    taps = []
    for dh in (-1, 0, 1):
        for dw in (-1, 0, 1):
            p = (2 if dh else 0) + (1 if dw else 0)
            sh = -1 if dh == -1 else 0
            sw = -1 if dw == -1 else 0
            xp = x_ph[p * c_in:(p + 1) * c_in, :]
            off = sh * wo + sw
            if off == 0:
                taps.append(xp)
            else:
                t = (sh + 1) * 3 + (sw + 1)
                taps.append(pltpu.roll(xp, shift=(-off) % lanes, axis=1) * masks_ref[t])
    return jnp.concatenate(taps, axis=0)


def _basic_block_kernel(x_ref, w1_ref, w2_ref, masks_ref, bn_ref, o_ref, *,
                        wo, c_in, planes, pad, stride):
    lanes = x_ref.shape[-1]                           # nb * Ho * Wo (static)
    x = x_ref[0].astype(jnp.float32)                  # (Cx, lanes)

    # conv1 (at output resolution) -> bn1 -> relu
    if stride == 1:
        p1 = _patches_stride1(x, masks_ref, wo, lanes)
    else:
        p1 = _patches_stride2(x, masks_ref, c_in, wo, lanes)
    acc1 = jnp.dot(w1_ref[...], p1.astype(jnp.bfloat16),     # bf16 MXU, f32 acc
                   preferred_element_type=jnp.float32)
    h1 = jnp.maximum(acc1 * bn_ref[0] + bn_ref[1], 0.0)      # (planes, lanes) f32

    # conv2 (stride 1 at output resolution) -> bn2
    p2 = _patches_stride1(h1, masks_ref, wo, lanes)
    acc2 = jnp.dot(w2_ref[...], p2.astype(jnp.bfloat16),
                   preferred_element_type=jnp.float32)
    pre = acc2 * bn_ref[2] + bn_ref[3]

    # shortcut + residual add + relu; one full-width store (no piecewise RMW stores)
    if stride == 1 and c_in == planes:
        sc = x
    else:
        sc_mid = x[:c_in, :]                           # phase (0,0) == x[:, :, ::2, ::2]
        if pad > 0:
            z = jnp.zeros((pad, lanes), jnp.float32)
            sc = jnp.concatenate([z, sc_mid, z], axis=0)
        else:
            sc = sc_mid
    o_ref[0] = jnp.maximum(pre + sc, 0.0).astype(o_ref.dtype)


# ---------------------------------------------------------------------------
# wrapper
# ---------------------------------------------------------------------------

@functools.partial(jax.jit, static_argnames=("stride", "eps"))
def basic_block_forward(x, w1, bn1, w2, bn2, *, stride=1, eps=1e-5):
    """Fused Pallas forward of BasicBlock (inference-mode BN).

    x  : (N, C_in, H, W)
    w1 : (planes, C_in, 3, 3)      bn1/bn2 : (gamma, beta, running_mean, running_var)
    w2 : (planes, planes, 3, 3)
    """
    N, c_in, H, W = x.shape
    planes = int(w1.shape[0])
    assert w1.shape == (planes, c_in, 3, 3)
    assert w2.shape == (planes, planes, 3, 3)
    out_dtype = x.dtype

    needs_lambda = (stride != 1) or (c_in != planes)
    if needs_lambda:
        assert stride == 2, "option-A shortcut path implemented for stride 2"
        pad = planes // 4
        assert c_in + 2 * pad == planes, (
            "option-A shortcut requires in_planes + 2*(planes//4) == planes")
        Ho, Wo = (H + 1) // 2, (W + 1) // 2
        # zero-pad odd H/W so every phase sub-image is exactly (Ho, Wo); the extra
        # zero row/col is precisely the conv's own zero padding at the bottom/right.
        if (H % 2) or (W % 2):
            x = jnp.pad(x, ((0, 0), (0, 0), (0, 2 * Ho - H), (0, 2 * Wo - W)))
        # 4-phase space-to-depth: stride-2 conv becomes a stride-1 tap pattern and the
        # option-A shortcut is simply phase (0,0).  (host-side XLA slices, no MXU work)
        x_ph = jnp.concatenate(
            [x[:, :, 0::2, 0::2], x[:, :, 0::2, 1::2],
             x[:, :, 1::2, 0::2], x[:, :, 1::2, 1::2]], axis=1)
        xk = x_ph.reshape(N, 4 * c_in, Ho * Wo)
        cx = 4 * c_in
    else:
        pad = 0
        Ho, Wo = H, W
        xk = x.reshape(N, c_in, H * W)
        cx = c_in
    HWo = Ho * Wo

    # fuse nb batch elements onto the lane axis -> one wide matmul RHS per conv
    nb = _pick_batch_block(N, HWo, c_in, planes)
    G = N // nb
    lanes = nb * HWo
    xk = xk.reshape(G, nb, cx, HWo).transpose(0, 2, 1, 3).reshape(G, cx, lanes)

    # inference-mode BN folded into per-channel scale/shift, packed as (4, planes, 1)
    g1, b1, rm1, rv1 = bn1
    g2, b2, rm2, rv2 = bn2
    s1 = g1 / jnp.sqrt(rv1 + eps)
    s2 = g2 / jnp.sqrt(rv2 + eps)
    bnp = jnp.stack([s1, b1 - rm1 * s1, s2, b2 - rm2 * s2]).astype(jnp.float32)
    bnp = bnp.reshape(4, planes, 1)

    # bf16 weight matrices (tap-major / input-channel-minor), f32 border masks
    w1m = jnp.transpose(w1, (0, 2, 3, 1)).reshape(planes, 9 * c_in).astype(jnp.bfloat16)
    w2m = jnp.transpose(w2, (0, 2, 3, 1)).reshape(planes, 9 * planes).astype(jnp.bfloat16)
    masks = jnp.asarray(np.tile(_make_masks(Ho, Wo), (1, 1, nb)))   # (9, 1, lanes)

    kernel = functools.partial(_basic_block_kernel, wo=Wo, c_in=c_in,
                               planes=planes, pad=pad, stride=stride)

    out = pl.pallas_call(
        kernel,
        out_shape=jax.ShapeDtypeStruct((G, planes, lanes), out_dtype),
        grid_spec=pltpu.PrefetchScalarGridSpec(
            num_scalar_prefetch=0,
            grid=(G,),
            in_specs=[
                pl.BlockSpec((1, cx, lanes), lambda n: (n, 0, 0)),
                pl.BlockSpec((planes, 9 * c_in), lambda n: (0, 0)),
                pl.BlockSpec((planes, 9 * planes), lambda n: (0, 0)),
                pl.BlockSpec((9, 1, lanes), lambda n: (0, 0, 0)),
                pl.BlockSpec((4, planes, 1), lambda n: (0, 0, 0)),
            ],
            out_specs=pl.BlockSpec((1, planes, lanes), lambda n: (n, 0, 0)),
        ),
        compiler_params=pltpu.CompilerParams(
            dimension_semantics=("parallel",),
            vmem_limit_bytes=32 * 1024 * 1024),
    )(xk, w1m, w2m, masks, bnp)

    # un-fuse the batch elements from the lane axis (host-side layout plumbing)
    out = out.reshape(G, planes, nb, HWo).transpose(0, 2, 1, 3)
    return out.reshape(N, planes, Ho, Wo)


# ---------------------------------------------------------------------------
# pure-JAX reference (mirrors the PyTorch module, eval-mode BN)
# ---------------------------------------------------------------------------

def _bn_ref(y, p, eps=1e-5):
    g, b, m, v = p
    return ((y - m[None, :, None, None]) / jnp.sqrt(v + eps)[None, :, None, None]
            * g[None, :, None, None] + b[None, :, None, None])


def _basic_block_ref(x, w1, bn1, w2, bn2, stride, eps=1e-5):
    dn = ("NCHW", "OIHW", "NCHW")
    hp = jax.lax.Precision.HIGHEST
    out = jax.lax.conv_general_dilated(x, w1, (stride, stride), ((1, 1), (1, 1)),
                                       dimension_numbers=dn, precision=hp)
    out = jax.nn.relu(_bn_ref(out, bn1, eps))
    out = jax.lax.conv_general_dilated(out, w2, (1, 1), ((1, 1), (1, 1)),
                                       dimension_numbers=dn, precision=hp)
    out = _bn_ref(out, bn2, eps)
    c_in, planes = x.shape[1], w1.shape[0]
    if stride != 1 or c_in != planes:
        pad = planes // 4
        sc = jnp.pad(x[:, :, ::2, ::2], ((0, 0), (pad, pad), (0, 0), (0, 0)))
    else:
        sc = x
    return jax.nn.relu(out + sc)


# ---------------------------------------------------------------------------
# demo / self-check
# ---------------------------------------------------------------------------

if __name__ == "__main__":
    keys = jax.random.split(jax.random.PRNGKey(0), 10)

    def bf16_round(a):          # keep conv1 products exact under bf16 MXU feeding
        return a.astype(jnp.bfloat16).astype(jnp.float32)

    def bn_params(k, planes):
        kg, kb, km, kv = jax.random.split(k, 4)
        gamma = 1.0 + 0.1 * jax.random.normal(kg, (planes,), jnp.float32)
        beta = 0.1 * jax.random.normal(kb, (planes,), jnp.float32)
        mean = 0.1 * jax.random.normal(km, (planes,), jnp.float32)
        var = 0.5 + jax.random.uniform(kv, (planes,), jnp.float32)
        return gamma, beta, mean, var

    def run_case(ki, N, c_in, H, W, planes, stride):
        k = jax.random.split(keys[ki], 5)
        x = bf16_round(jax.random.normal(k[0], (N, c_in, H, W), jnp.float32))
        w1 = bf16_round(0.2 * jax.random.normal(k[1], (planes, c_in, 3, 3), jnp.float32))
        w2 = bf16_round(0.2 * jax.random.normal(k[2], (planes, planes, 3, 3), jnp.float32))
        bn1 = bn_params(k[3], planes)
        bn2 = bn_params(k[4], planes)
        y = jax.block_until_ready(basic_block_forward(x, w1, bn1, w2, bn2, stride=stride))
        y_ref = _basic_block_ref(x, w1, bn1, w2, bn2, stride)
        ho, wo = ((H + 1) // 2, (W + 1) // 2) if stride == 2 else (H, W)
        assert y.shape == (N, planes, ho, wo), y.shape
        # conv2's input is rounded to bf16 in-kernel (MXU feeding) but not in the f32
        # reference, so allow a modest tolerance; real bugs show up as O(1) errors.
        err = float(jnp.max(jnp.abs(y - y_ref)))
        assert err < 1e-1, f"mismatch vs reference, max abs err = {err}"

    # CIFAR-style stride-2 option-A transition block (in_planes == planes // 2)
    run_case(0, N=4, c_in=4, H=16, W=16, planes=8, stride=2)
    # identity-shortcut stride-1 block
    run_case(1, N=2, c_in=8, H=16, W=16, planes=8, stride=1)

    print("KERNEL_OK")
</pallas_src>

<mosaic_0001>
module attributes {stable_mosaic.version = 11 : i64} {
  func.func @_basic_block_kernel(%arg0: i32, %arg1: memref<1x16x128xf32, #tpu.memory_space<vmem>>, %arg2: memref<8x36xbf16, #tpu.memory_space<vmem>>, %arg3: memref<8x72xbf16, #tpu.memory_space<vmem>>, %arg4: memref<9x1x128xf32, #tpu.memory_space<vmem>>, %arg5: memref<4x8x1xf32, #tpu.memory_space<vmem>>, %arg6: memref<1x8x128xf32, #tpu.memory_space<vmem>>) attributes {dimension_semantics = [#tpu.dimension_semantics<parallel>], iteration_bounds = array<i64: 2>, scalar_prefetch = 0 : i64, scratch_operands = 0 : i64, tpu.core_type = #tpu.core_type<tc>, window_params = [{transform_indices = @transform_0, window_bounds = array<i64: 1, 16, 128>}, {pipeline_mode = #tpu.pipeline_mode<synchronous>, transform_indices = @transform_1, window_bounds = array<i64: 8, 36>}, {pipeline_mode = #tpu.pipeline_mode<synchronous>, transform_indices = @transform_2, window_bounds = array<i64: 8, 72>}, {pipeline_mode = #tpu.pipeline_mode<synchronous>, transform_indices = @transform_3, window_bounds = array<i64: 9, 1, 128>}, {pipeline_mode = #tpu.pipeline_mode<synchronous>, transform_indices = @transform_4, window_bounds = array<i64: 4, 8, 1>}, {transform_indices = @transform_5, window_bounds = array<i64: 1, 8, 128>}]} {
    %c0 = arith.constant 0 : index
    %c0_0 = arith.constant 0 : index
    %c0_1 = arith.constant 0 : index
    %0 = vector.load %arg1[%c0, %c0_0, %c0_1] : memref<1x16x128xf32, #tpu.memory_space<vmem>>, vector<1x16x128xf32>
    %1 = vector.shape_cast %0 : vector<1x16x128xf32> to vector<16x128xf32>
    %2 = vector.extract_strided_slice %1 {offsets = [12, 0], sizes = [4, 128], strides = [1, 1]} : vector<16x128xf32> to vector<4x128xf32>
    %c9_i32 = arith.constant 9 : i32
    %3 = tpu.dynamic_rotate %2 by %c9_i32 dim 1 : vector<4x128xf32>, i32 -> vector<4x128xf32>
    %c0_2 = arith.constant 0 : index
    %c0_3 = arith.constant 0 : index
    %c0_4 = arith.constant 0 : index
    %4 = vector.load %arg4[%c0_2, %c0_3, %c0_4] : memref<9x1x128xf32, #tpu.memory_space<vmem>>, vector<1x1x128xf32>
    %5 = vector.shape_cast %4 : vector<1x1x128xf32> to vector<1x128xf32>
    %6 = vector.broadcast %5 : vector<1x128xf32> to vector<4x128xf32>
    %7 = arith.mulf %3, %6 : vector<4x128xf32>
    %8 = vector.extract_strided_slice %1 {offsets = [8, 0], sizes = [4, 128], strides = [1, 1]} : vector<16x128xf32> to vector<4x128xf32>
    %c8_i32 = arith.constant 8 : i32
    %9 = tpu.dynamic_rotate %8 by %c8_i32 dim 1 : vector<4x128xf32>, i32 -> vector<4x128xf32>
    %c1 = arith.constant 1 : index
    %c0_5 = arith.constant 0 : index
    %c0_6 = arith.constant 0 : index
    %10 = vector.load %arg4[%c1, %c0_5, %c0_6] : memref<9x1x128xf32, #tpu.memory_space<vmem>>, vector<1x1x128xf32>
    %11 = vector.shape_cast %10 : vector<1x1x128xf32> to vector<1x128xf32>
    %12 = vector.broadcast %11 : vector<1x128xf32> to vector<4x128xf32>
    %13 = arith.mulf %9, %12 : vector<4x128xf32>
    %14 = vector.extract_strided_slice %1 {offsets = [12, 0], sizes = [4, 128], strides = [1, 1]} : vector<16x128xf32> to vector<4x128xf32>
    %c8_i32_7 = arith.constant 8 : i32
    %15 = tpu.dynamic_rotate %14 by %c8_i32_7 dim 1 : vector<4x128xf32>, i32 -> vector<4x128xf32>
    %c1_8 = arith.constant 1 : index
    %c0_9 = arith.constant 0 : index
    %c0_10 = arith.constant 0 : index
    %16 = vector.load %arg4[%c1_8, %c0_9, %c0_10] : memref<9x1x128xf32, #tpu.memory_space<vmem>>, vector<1x1x128xf32>
    %17 = vector.shape_cast %16 : vector<1x1x128xf32> to vector<1x128xf32>
    %18 = vector.broadcast %17 : vector<1x128xf32> to vector<4x128xf32>
    %19 = arith.mulf %15, %18 : vector<4x128xf32>
    %20 = vector.extract_strided_slice %1 {offsets = [4, 0], sizes = [4, 128], strides = [1, 1]} : vector<16x128xf32> to vector<4x128xf32>
    %c1_i32 = arith.constant 1 : i32
    %21 = tpu.dynamic_rotate %20 by %c1_i32 dim 1 : vector<4x128xf32>, i32 -> vector<4x128xf32>
    %c3 = arith.constant 3 : index
    %c0_11 = arith.constant 0 : index
    %c0_12 = arith.constant 0 : index
    %22 = vector.load %arg4[%c3, %c0_11, %c0_12] : memref<9x1x128xf32, #tpu.memory_space<vmem>>, vector<1x1x128xf32>
    %23 = vector.shape_cast %22 : vector<1x1x128xf32> to vector<1x128xf32>
    %24 = vector.broadcast %23 : vector<1x128xf32> to vector<4x128xf32>
    %25 = arith.mulf %21, %24 : vector<4x128xf32>
    %26 = vector.extract_strided_slice %1 {offsets = [0, 0], sizes = [4, 128], strides = [1, 1]} : vector<16x128xf32> to vector<4x128xf32>
    %27 = vector.extract_strided_slice %1 {offsets = [4, 0], sizes = [4, 128], strides = [1, 1]} : vector<16x128xf32> to vector<4x128xf32>
    %28 = vector.extract_strided_slice %1 {offsets = [12, 0], sizes = [4, 128], strides = [1, 1]} : vector<16x128xf32> to vector<4x128xf32>
    %c1_i32_13 = arith.constant 1 : i32
    %29 = tpu.dynamic_rotate %28 by %c1_i32_13 dim 1 : vector<4x128xf32>, i32 -> vector<4x128xf32>
    %c3_14 = arith.constant 3 : index
    %c0_15 = arith.constant 0 : index
    %c0_16 = arith.constant 0 : index
    %30 = vector.load %arg4[%c3_14, %c0_15, %c0_16] : memref<9x1x128xf32, #tpu.memory_space<vmem>>, vector<1x1x128xf32>
    %31 = vector.shape_cast %30 : vector<1x1x128xf32> to vector<1x128xf32>
    %32 = vector.broadcast %31 : vector<1x128xf32> to vector<4x128xf32>
    %33 = arith.mulf %29, %32 : vector<4x128xf32>
    %34 = vector.extract_strided_slice %1 {offsets = [8, 0], sizes = [4, 128], strides = [1, 1]} : vector<16x128xf32> to vector<4x128xf32>
    %35 = vector.extract_strided_slice %1 {offsets = [12, 0], sizes = [4, 128], strides = [1, 1]} : vector<16x128xf32> to vector<4x128xf32>
    %36 = tpu.concatenate %7, %13, %19, %25, %26, %27, %33, %34, %35 in 0 : vector<4x128xf32>, vector<4x128xf32>, vector<4x128xf32>, vector<4x128xf32>, vector<4x128xf32>, vector<4x128xf32>, vector<4x128xf32>, vector<4x128xf32>, vector<4x128xf32> -> vector<36x128xf32>
    %c0_17 = arith.constant 0 : index
    %c0_18 = arith.constant 0 : index
    %37 = vector.load %arg2[%c0_17, %c0_18] : memref<8x36xbf16, #tpu.memory_space<vmem>>, vector<8x36xbf16>
    %38 = arith.truncf %36 : vector<36x128xf32> to vector<36x128xbf16>
    %cst = arith.constant dense<0.000000e+00> : vector<8x128xf32>
    %39 = tpu.matmul %37, %38, %cst {dimension_numbers = #tpu.dot_dimension_numbers<[1], [0], [0], [1], [0, 0, 1, 1], [], []>} : vector<8x36xbf16>, vector<36x128xbf16>, vector<8x128xf32> -> vector<8x128xf32>
    %c0_19 = arith.constant 0 : index
    %c0_20 = arith.constant 0 : index
    %c0_21 = arith.constant 0 : index
    %40 = vector.load %arg5[%c0_19, %c0_20, %c0_21] : memref<4x8x1xf32, #tpu.memory_space<vmem>>, vector<1x8x1xf32>
    %41 = vector.shape_cast %40 : vector<1x8x1xf32> to vector<8x1xf32>
    %42 = vector.broadcast %41 : vector<8x1xf32> to vector<8x128xf32>
    %43 = arith.mulf %39, %42 : vector<8x128xf32>
    %c1_22 = arith.constant 1 : index
    %c0_23 = arith.constant 0 : index
    %c0_24 = arith.constant 0 : index
    %44 = vector.load %arg5[%c1_22, %c0_23, %c0_24] : memref<4x8x1xf32, #tpu.memory_space<vmem>>, vector<1x8x1xf32>
    %45 = vector.shape_cast %44 : vector<1x8x1xf32> to vector<8x1xf32>
    %46 = vector.broadcast %45 : vector<8x1xf32> to vector<8x128xf32>
    %47 = arith.addf %43, %46 : vector<8x128xf32>
    %cst_25 = arith.constant 0.000000e+00 : f32
    %48 = vector.broadcast %cst_25 : f32 to vector<8x128xf32>
    %49 = arith.maximumf %47, %48 : vector<8x128xf32>
    %c9_i32_26 = arith.constant 9 : i32
    %50 = tpu.dynamic_rotate %49 by %c9_i32_26 dim 1 : vector<8x128xf32>, i32 -> vector<8x128xf32>
    %c0_27 = arith.constant 0 : index
    %c0_28 = arith.constant 0 : index
    %c0_29 = arith.constant 0 : index
    %51 = vector.load %arg4[%c0_27, %c0_28, %c0_29] : memref<9x1x128xf32, #tpu.memory_space<vmem>>, vector<1x1x128xf32>
    %52 = vector.shape_cast %51 : vector<1x1x128xf32> to vector<1x128xf32>
    %53 = vector.broadcast %52 : vector<1x128xf32> to vector<8x128xf32>
    %54 = arith.mulf %50, %53 : vector<8x128xf32>
    %c8_i32_30 = arith.constant 8 : i32
    %55 = tpu.dynamic_rotate %49 by %c8_i32_30 dim 1 : vector<8x128xf32>, i32 -> vector<8x128xf32>
    %c1_31 = arith.constant 1 : index
    %c0_32 = arith.constant 0 : index
    %c0_33 = arith.constant 0 : index
    %56 = vector.load %arg4[%c1_31, %c0_32, %c0_33] : memref<9x1x128xf32, #tpu.memory_space<vmem>>, vector<1x1x128xf32>
    %57 = vector.shape_cast %56 : vector<1x1x128xf32> to vector<1x128xf32>
    %58 = vector.broadcast %57 : vector<1x128xf32> to vector<8x128xf32>
    %59 = arith.mulf %55, %58 : vector<8x128xf32>
    %c7_i32 = arith.constant 7 : i32
    %60 = tpu.dynamic_rotate %49 by %c7_i32 dim 1 : vector<8x128xf32>, i32 -> vector<8x128xf32>
    %c2 = arith.constant 2 : index
    %c0_34 = arith.constant 0 : index
    %c0_35 = arith.constant 0 : index
    %61 = vector.load %arg4[%c2, %c0_34, %c0_35] : memref<9x1x128xf32, #tpu.memory_space<vmem>>, vector<1x1x128xf32>
    %62 = vector.shape_cast %61 : vector<1x1x128xf32> to vector<1x128xf32>
    %63 = vector.broadcast %62 : vector<1x128xf32> to vector<8x128xf32>
    %64 = arith.mulf %60, %63 : vector<8x128xf32>
    %c1_i32_36 = arith.constant 1 : i32
    %65 = tpu.dynamic_rotate %49 by %c1_i32_36 dim 1 : vector<8x128xf32>, i32 -> vector<8x128xf32>
    %c3_37 = arith.constant 3 : index
    %c0_38 = arith.constant 0 : index
    %c0_39 = arith.constant 0 : index
    %66 = vector.load %arg4[%c3_37, %c0_38, %c0_39] : memref<9x1x128xf32, #tpu.memory_space<vmem>>, vector<1x1x128xf32>
    %67 = vector.shape_cast %66 : vector<1x1x128xf32> to vector<1x128xf32>
    %68 = vector.broadcast %67 : vector<1x128xf32> to vector<8x128xf32>
    %69 = arith.mulf %65, %68 : vector<8x128xf32>
    %c127_i32 = arith.constant 127 : i32
    %70 = tpu.dynamic_rotate %49 by %c127_i32 dim 1 : vector<8x128xf32>, i32 -> vector<8x128xf32>
    %c5 = arith.constant 5 : index
    %c0_40 = arith.constant 0 : index
    %c0_41 = arith.constant 0 : index
    %71 = vector.load %arg4[%c5, %c0_40, %c0_41] : memref<9x1x128xf32, #tpu.memory_space<vmem>>, vector<1x1x128xf32>
    %72 = vector.shape_cast %71 : vector<1x1x128xf32> to vector<1x128xf32>
    %73 = vector.broadcast %72 : vector<1x128xf32> to vector<8x128xf32>
    %74 = arith.mulf %70, %73 : vector<8x128xf32>
    %c121_i32 = arith.constant 121 : i32
    %75 = tpu.dynamic_rotate %49 by %c121_i32 dim 1 : vector<8x128xf32>, i32 -> vector<8x128xf32>
    %c6 = arith.constant 6 : index
    %c0_42 = arith.constant 0 : index
    %c0_43 = arith.constant 0 : index
    %76 = vector.load %arg4[%c6, %c0_42, %c0_43] : memref<9x1x128xf32, #tpu.memory_space<vmem>>, vector<1x1x128xf32>
    %77 = vector.shape_cast %76 : vector<1x1x128xf32> to vector<1x128xf32>
    %78 = vector.broadcast %77 : vector<1x128xf32> to vector<8x128xf32>
    %79 = arith.mulf %75, %78 : vector<8x128xf32>
    %c120_i32 = arith.constant 120 : i32
    %80 = tpu.dynamic_rotate %49 by %c120_i32 dim 1 : vector<8x128xf32>, i32 -> vector<8x128xf32>
    %c7 = arith.constant 7 : index
    %c0_44 = arith.constant 0 : index
    %c0_45 = arith.constant 0 : index
    %81 = vector.load %arg4[%c7, %c0_44, %c0_45] : memref<9x1x128xf32, #tpu.memory_space<vmem>>, vector<1x1x128xf32>
    %82 = vector.shape_cast %81 : vector<1x1x128xf32> to vector<1x128xf32>
    %83 = vector.broadcast %82 : vector<1x128xf32> to vector<8x128xf32>
    %84 = arith.mulf %80, %83 : vector<8x128xf32>
    %c119_i32 = arith.constant 119 : i32
    %85 = tpu.dynamic_rotate %49 by %c119_i32 dim 1 : vector<8x128xf32>, i32 -> vector<8x128xf32>
    %c8 = arith.constant 8 : index
    %c0_46 = arith.constant 0 : index
    %c0_47 = arith.constant 0 : index
    %86 = vector.load %arg4[%c8, %c0_46, %c0_47] : memref<9x1x128xf32, #tpu.memory_space<vmem>>, vector<1x1x128xf32>
    %87 = vector.shape_cast %86 : vector<1x1x128xf32> to vector<1x128xf32>
    %88 = vector.broadcast %87 : vector<1x128xf32> to vector<8x128xf32>
    %89 = arith.mulf %85, %88 : vector<8x128xf32>
    %90 = tpu.concatenate %54, %59, %64, %69, %49, %74, %79, %84, %89 in 0 : vector<8x128xf32>, vector<8x128xf32>, vector<8x128xf32>, vector<8x128xf32>, vector<8x128xf32>, vector<8x128xf32>, vector<8x128xf32>, vector<8x128xf32>, vector<8x128xf32> -> vector<72x128xf32>
    %c0_48 = arith.constant 0 : index
    %c0_49 = arith.constant 0 : index
    %91 = vector.load %arg3[%c0_48, %c0_49] : memref<8x72xbf16, #tpu.memory_space<vmem>>, vector<8x72xbf16>
    %92 = arith.truncf %90 : vector<72x128xf32> to vector<72x128xbf16>
    %cst_50 = arith.constant dense<0.000000e+00> : vector<8x128xf32>
    %93 = tpu.matmul %91, %92, %cst_50 {dimension_numbers = #tpu.dot_dimension_numbers<[1], [0], [0], [1], [0, 0, 1, 1], [], []>} : vector<8x72xbf16>, vector<72x128xbf16>, vector<8x128xf32> -> vector<8x128xf32>
    %c2_51 = arith.constant 2 : index
    %c0_52 = arith.constant 0 : index
    %c0_53 = arith.constant 0 : index
    %94 = vector.load %arg5[%c2_51, %c0_52, %c0_53] : memref<4x8x1xf32, #tpu.memory_space<vmem>>, vector<1x8x1xf32>
    %95 = vector.shape_cast %94 : vector<1x8x1xf32> to vector<8x1xf32>
    %96 = vector.broadcast %95 : vector<8x1xf32> to vector<8x128xf32>
    %97 = arith.mulf %93, %96 : vector<8x128xf32>
    %c3_54 = arith.constant 3 : index
    %c0_55 = arith.constant 0 : index
    %c0_56 = arith.constant 0 : index
    %98 = vector.load %arg5[%c3_54, %c0_55, %c0_56] : memref<4x8x1xf32, #tpu.memory_space<vmem>>, vector<1x8x1xf32>
    %99 = vector.shape_cast %98 : vector<1x8x1xf32> to vector<8x1xf32>
    %100 = vector.broadcast %99 : vector<8x1xf32> to vector<8x128xf32>
    %101 = arith.addf %97, %100 : vector<8x128xf32>
    %102 = vector.extract_strided_slice %1 {offsets = [0, 0], sizes = [4, 128], strides = [1, 1]} : vector<16x128xf32> to vector<4x128xf32>
    %cst_57 = arith.constant 0.000000e+00 : f32
    %103 = vector.broadcast %cst_57 : f32 to vector<2x128xf32>
    %104 = tpu.concatenate %103, %102, %103 in 0 : vector<2x128xf32>, vector<4x128xf32>, vector<2x128xf32> -> vector<8x128xf32>
    %105 = arith.addf %101, %104 : vector<8x128xf32>
    %cst_58 = arith.constant 0.000000e+00 : f32
    %106 = vector.broadcast %cst_58 : f32 to vector<8x128xf32>
    %107 = arith.maximumf %105, %106 : vector<8x128xf32>
    %c0_59 = arith.constant 0 : index
    %c0_60 = arith.constant 0 : index
    %c0_61 = arith.constant 0 : index
    %108 = vector.load %arg6[%c0_59, %c0_60, %c0_61] : memref<1x8x128xf32, #tpu.memory_space<vmem>>, vector<1x8x128xf32>
    %109 = vector.shape_cast %108 : vector<1x8x128xf32> to vector<8x128xf32>
    %110 = vector.shape_cast %107 : vector<8x128xf32> to vector<1x8x128xf32>
    tpu.vector_store %arg6[%c0_59, %c0_60, %c0_61], %110 {strides = array<i32>} : memref<1x8x128xf32, #tpu.memory_space<vmem>>, vector<1x8x128xf32>,
    return
  }
  func.func @transform_0(%arg0: i32) -> (i32, i32, i32) {
    %c0_i32 = arith.constant 0 : i32
    %c0_i32_0 = arith.constant 0 : i32
    %c0_i32_1 = arith.constant 0 : i32
    return %arg0, %c0_i32, %c0_i32_0 : i32, i32, i32
  }
  func.func @transform_1(%arg0: i32) -> (i32, i32) {
    %c0_i32 = arith.constant 0 : i32
    %c0_i32_0 = arith.constant 0 : i32
    %c0_i32_1 = arith.constant 0 : i32
    return %c0_i32, %c0_i32_0 : i32, i32
  }
  func.func @transform_2(%arg0: i32) -> (i32, i32) {
    %c0_i32 = arith.constant 0 : i32
    %c0_i32_0 = arith.constant 0 : i32
    %c0_i32_1 = arith.constant 0 : i32
    return %c0_i32, %c0_i32_0 : i32, i32
  }
  func.func @transform_3(%arg0: i32) -> (i32, i32, i32) {
    %c0_i32 = arith.constant 0 : i32
    %c0_i32_0 = arith.constant 0 : i32
    %c0_i32_1 = arith.constant 0 : i32
    %c0_i32_2 = arith.constant 0 : i32
    return %c0_i32, %c0_i32_0, %c0_i32_1 : i32, i32, i32
  }
  func.func @transform_4(%arg0: i32) -> (i32, i32, i32) {
    %c0_i32 = arith.constant 0 : i32
    %c0_i32_0 = arith.constant 0 : i32
    %c0_i32_1 = arith.constant 0 : i32
    %c0_i32_2 = arith.constant 0 : i32
    return %c0_i32, %c0_i32_0, %c0_i32_1 : i32, i32, i32
  }
  func.func @transform_5(%arg0: i32) -> (i32, i32, i32) {
    %c0_i32 = arith.constant 0 : i32
    %c0_i32_0 = arith.constant 0 : i32
    %c0_i32_1 = arith.constant 0 : i32
    return %arg0, %c0_i32, %c0_i32_0 : i32, i32, i32
  }
}

</mosaic_0001>

<bundles_post_ra>
// kernel: basic_block_forward.1
= control target key start
LH: loop header
LB: loop body
LE: loop exit
PB: predicated region body
PF: predicated region fallthrough
CT: control target
= control target key end

     0   :  { %s562_s18 = smov 0   ;;  %s658_s0 = inlined_call_operand.vmem [shape: f32[2,16,128], index: 0, kind: input, shape index: {}]   ;;  %s659_s1 = inlined_call_operand.vmem [shape: bf16[8,36], index: 1, kind: input, shape index: {}]   ;;  %s660_s2 = inlined_call_operand.vmem [shape: bf16[8,72], index: 2, kind: input, shape index: {}]   ;;  %s661_s3 = inlined_call_operand.vmem [shape: f32[9,1,128], index: 3, kind: input, shape index: {}]   ;;  %s662_s4 = inlined_call_operand.vmem [shape: f32[4,8,1], index: 4, kind: input, shape index: {}]   ;;  %s663_s5 = inlined_call_operand.vmem [shape: f32[2,8,128], index: 5, kind: output, shape index: {}]  }
   0x1 LB: > { %s464_s19 = sadd.s32 4294967295, %s521_s18   ;;  %p468_p0 = scmp.ge.s32.totalorder %s521_s18, 1  ;;  %s521_s18 = sphi %s562_s18, %s15_s18  }
   0x2   : > { %p187_p1 = scmp.lt.s32.totalorder %s521_s18, 3 }
   0x4   : > { %p188_p2 = pnand %p468_p0, %p187_p1 }
   0x5   : > { %p214_p3 = scmp.lt.s32.totalorder (!%p188_p2), %s464_s19, 1  ;;  %s523_s24 = smov (!%p188_p2), 1  }
   0x6   : > { %191 = sbr.rel (%p188_p2) target bundleno = 560 (0x230), region = 40  ;;  %s524_s25 = smov (!%p188_p2), 8  }
   0x7   : > { %s525_s26 = smov (!%p188_p2), 9   ;;  %s527_s14 = smov (!%p188_p2), 7  }
   0x8   : > { %s528_s15 = smov (!%p188_p2), 121   ;;  %s529_s16 = smov (!%p188_p2), 119  }
   0x9   : > { %s530_s17 = smov (!%p188_p2), 127  }
   0xb   : > { %s665_s19 = smov (!%p214_p3, %s464_s19), 1  ;;  %vm279_vm0 = vcmask 1041408   ;;  %v475_v6 = vld [vmem:[%s662_s4 + $0x8] sm:$0xff]  ;;  %v296_v7 = vld [vmem:[%s662_s4] sm:$0xff]  ;;  %v526_v8 = vmov 0   ;;  %vm267_vm1 = vcmask 1043456  }
   0xc   : > { %s486_s20 = sshll.u32 %s665_s19, 4  ;;  %505 = vset.pattern.permute.xlu0 %v526_v8  ;;  %504 = vset.pattern.permute.xlu2 %v526_v8  ;;  %v594_v9 = vld [vmem:[%s661_s3 + $0x3] ss:$0 sm:$0xff]  ;;  %v603_v16 = vld [vmem:[%s661_s3 + $0x1] ss:$0 sm:$0xff]  ;;  %vm275_vm2 = vcmask 293888  }
   0xd   : > { %s218_s23 = scalar_lea.vmem %s658_s0, %s486_s20  ;;  %506 = vset.pattern.permute.xlu1 %v526_v8  ;;  %v608_v17 = vld [vmem:[%s661_s3] ss:$0 sm:$0xff]  ;;  %s531_s20 = smov 120   ;;  %v483_v37 = vld [vmem:[%s662_s4 + $0x18] sm:$0xff]  ;;  %v482_v38 = vld [vmem:[%s662_s4 + $0x10] sm:$0xff]  ;;  %vm367_vm3 = vcmask 588800  }
   0xe   : > { %v225_v0 = vld [vmem:[%s218_s23 + $0x8] sm:$0xff]  ;;  %v576_v1 = vld [vmem:[%s218_s23] sm:$0xff]  ;;  %vm406_vm4 = vcmask 1045504   ;;  %s471_s12 = sshll.u32 %s665_s19, 3 }
   0xf   : > { %v227_v2 = vrot.slane %v225_v0, 4  ;;  %v248_v3 = vrot.slane %v576_v1, 4  ;;  %v271_v29 = vld [vmem:[%s659_s1] sm:$0xf]  ;;  %v513_v39 = vld [vmem:[%s661_s3 + $0x8] ss:$0 sm:$0xff] }
  0x10   : > { %v510_v44 = vld [vmem:[%s661_s3 + $0x6] ss:$0 sm:$0xff]  ;;  %v514_v46 = vld [vmem:[%s661_s3 + $0x7] ss:$0 sm:$0xff]  ;;  %v511_v48 = vld [vmem:[%s661_s3 + $0x5] ss:$0 sm:$0xff] }
  0x11   : > { %258 = vrot.lane.b32.xlu0 %v227_v2, %s523_s24  ;;  %250 = vrot.lane.b32.xlu1 %v248_v3, %s523_s24  ;;  %v274_v4 = vpack.c.bf16 %v227_v2, %v227_v2  ;;  %v512_v55 = vld [vmem:[%s661_s3 + $0x2] ss:$0 sm:$0xff] }
  0x12   : > { %244 = vrot.lane.b32.xlu2 %v227_v2, %s524_s25  ;;  %v361_v3 = vld [vmem:[%s660_s2] sm:$0xf] }
  0x13   : > { %v281_v5 = vsel %vm279_vm0, %v274_v4, 0  ;;  %v403_v4 = vrot.slane %v576_v1, 6 }
  0x14   : > { %288 = vmatpush.bf16.msra.mxu0 %v281_v5 }
  0x19   : > { %236 = vrot.lane.b32.xlu0 %v225_v0, %s524_s25  ;;  %229 = vrot.lane.b32.xlu1 %v227_v2, %s525_s26 }
  0x1a   : > { %299 = vperm.xlu2 %504, %v296_v7  }
  0x21   : > { %307 = vperm.xlu0 %505, %v475_v6   ;;  %v405_v6 = vsel %vm279_vm0, 0.0, %v403_v4 }
  0x6c   : > { %v245_v18 = vpop.permute.xlu2 %244 }
  0x6d   : > { %v246_v22 = vmul.f32 %v603_v16, %v245_v18 }
  0x74   : > { %v300_v30 = vpop.permute.xlu2 %299 }
  0x83   : > { %v259_v10 = vpop.permute.xlu0 %258  ;;  %v251_v11 = vpop.permute.xlu1 %250 }
  0x84   : > { %v260_v12 = vmul.f32 %v594_v9, %v259_v10  ;;  %v257_v15 = vmul.f32 %v594_v9, %v251_v11 }
  0x86   : > { %v270_v13 = vsel %vm267_vm1, %v260_v12, %v227_v2  ;;  %v265_v21 = vrot.slane %v257_v15, 4 }
  0x87   : > { %v273_v14 = vpack.c.bf16 %v270_v13, %v576_v1 }
  0x88   : > { %v269_v27 = vsel %vm267_vm1, %v246_v22, %v265_v21 }
  0x89   : > { %289 = vmatpush.bf16.msra.mxu0 %v273_v14 }
  0x8b   : > { %v237_v19 = vpop.permute.xlu0 %236  ;;  %v230_v20 = vpop.permute.xlu1 %229 }
  0x8c   : > { %v243_v23 = vmul.f32 %v603_v16, %v237_v19  ;;  %v235_v24 = vmul.f32 %v608_v17, %v230_v20 }
  0x8e   : > { %v262_v25 = vrot.slane %v243_v23, 4 }
  0x90   : > { %v268_v26 = vsel %vm267_vm1, %v235_v24, %v262_v25 }
  0x91   : > { %v272_v28 = vpack.c.bf16 %v269_v27, %v268_v26 }
  0x93   : > { %290 = vmatpush.bf16.msra.mxu0 %v272_v28  ;;  %v308_v32 = vpop.permute.xlu0 %307 }
  0x96   : > { %474 = vmatmul.msk.bf16.vlgmr.msra.gmra.mxu0 %vm275_vm2, %v271_v29 }
 0x113   : > { %v292_v31 = vpop.f32.mrf.mxu0 }
 0x114   : > { %v302_v33 = vmul.f32 %v300_v30, %v292_v31 }
 0x116   : > { %v310_v34 = vadd.f32 %v308_v32, %v302_v33 }
 0x118   : > { %v311_v35 = vmax.f32 %v310_v34, 0.0 }
 0x11a   : > { %318 = vrot.lane.b32.xlu0 %v311_v35, %s527_s14  ;;  %337 = vrot.lane.b32.xlu2 %v311_v35, %s528_s15  ;;  %s222_s15 = scalar_lea.vmem %s663_s5, %s471_s12 }
 0x11b   : > { %353 = vrot.lane.b32.xlu1 %v311_v35, %s529_s16  ;;  %v294_v36 = vpop.f32.mrf.mxu0 }
 0x122   : > { %315 = vrot.lane.b32.xlu0 %v311_v35, %s524_s25  ;;  %329 = vrot.lane.b32.xlu2 %v311_v35, %s530_s17 }
 0x123   : > { %345 = vrot.lane.b32.xlu1 %v311_v35, %s531_s20 }
 0x12a   : > { %312 = vrot.lane.b32.xlu2 %v311_v35, %s525_s26 }
 0x12b   : > { %326 = vrot.lane.b32.xlu1 %v311_v35, %s523_s24 }
 0x132   : > { %399 = vperm.xlu2 %504, %v483_v37  }
 0x133   : > { %391 = vperm.xlu1 %506, %v482_v38  }
 0x174   : > { %v338_v40 = vpop.permute.xlu2 %337 }
 0x175   : > { %v344_v51 = vmul.f32 %v510_v44, %v338_v40 }
 0x17c   : > { %v330_v49 = vpop.permute.xlu2 %329 }
 0x17d   : > { %v336_v53 = vmul.f32 %v511_v48, %v330_v49 }
 0x17f   : > { %v364_v56 = vpack.c.bf16 %v336_v53, %v311_v35 }
 0x184   : > { %v313_v61 = vpop.permute.xlu2 %312 }
 0x185   : > { %v314_v0 = vmul.f32 %v608_v17, %v313_v61 }
 0x18c   : > { %v319_v47 = vpop.permute.xlu0 %318  ;;  %v400_v10 = vpop.permute.xlu2 %399 }
 0x18d   : > { %v354_v41 = vpop.permute.xlu1 %353  ;;  %v325_v59 = vmul.f32 %v512_v55, %v319_v47 }
 0x18e   : > { %v360_v42 = vmul.f32 %v513_v39, %v354_v41 }
 0x190   : > { %v366_v43 = vpack.c.bf16 %v360_v42, %v360_v42 }
 0x192   : > { %v372_v45 = vsel %vm267_vm1, %v366_v43, 0 }
 0x193   : > { %377 = vmatpush.bf16.msra.mxu1 %v372_v45 }
 0x194   : > { %v316_v57 = vpop.permute.xlu0 %315 }
 0x195   : > { %v346_v50 = vpop.permute.xlu1 %345  ;;  %v317_v62 = vmul.f32 %v603_v16, %v316_v57 }
 0x196   : > { %v352_v52 = vmul.f32 %v514_v46, %v346_v50 }
 0x197   : > { %v362_v2 = vpack.c.bf16 %v317_v62, %v314_v0 }
 0x198   : > { %v365_v54 = vpack.c.bf16 %v352_v52, %v344_v51 }
 0x19a   : > { %378 = vmatpush.bf16.msra.mxu1 %v365_v54 }
 0x19d   : > { %v327_v58 = vpop.permute.xlu1 %326 }
 0x19e   : > { %v328_v60 = vmul.f32 %v594_v9, %v327_v58  ;;  %379 = vmatpush.bf16.msra.mxu1 %v364_v56  ;;  %v407_v9 = vsel %vm406_vm4, %v405_v6, 0.0 }
 0x1a0   : > { %v363_v63 = vpack.c.bf16 %v328_v60, %v325_v59 }
 0x1a2   : > { %380 = vmatpush.bf16.msra.mxu1 %v363_v63 }
 0x1a5   : > { %v392_v5 = vpop.permute.xlu1 %391 }
 0x1a6   : > { %381 = vmatpush.bf16.msra.mxu1 %v362_v2 }
 0x1a9   : > { %481 = vmatmul.msk.bf16.vlgmr.msra.gmra.mxu1 %vm367_vm3, %v361_v3 }
 0x226   : > { %v383_v7 = vpop.f32.mrf.mxu1 }
 0x227   : > { %v394_v8 = vmul.f32 %v392_v5, %v383_v7 }
 0x229   : > { %v402_v11 = vadd.f32 %v400_v10, %v394_v8 }
 0x22b   : > { %v408_v12 = vadd.f32 %v407_v9, %v402_v11 }
 0x22d   : > { %v409_v13 = vmax.f32 %v408_v12, 0.0 }
 0x22e   : > { %v385_v14 = vpop.f32.mrf.mxu1 }
 0x22f   : > { %410 = vst [vmem:[%s222_s15] sm:$0xff] %v409_v13 }
 0x230 PF: > { %s15_s18 = sadd.s32 1, %s521_s18  }
 0x231   : > { %p12_p4 = scmp.ge.s32.totalorder %s15_s18, 4  }
 0x233   :  { %14 = sbr.rel (!%p12_p4) target bundleno = 1 (0x1), region = 80 }

</bundles_post_ra>
